<compile_context>
chip_gen: v7x
topology: tpu7x:2x2x1
jax: 0.10.0
libtpu: 0.0.40
codegen_flags: <defaults>
</compile_context>

<pallas_src>
import functools

import jax
import jax.numpy as jnp
from jax.experimental import pallas as pl
from jax.experimental.pallas import tpu as pltpu

_MAX_ROW_TILE = 512
_SINGLE_BUFFER_WEIGHTS = None  # probed once: does this jax accept pl.Buffered(1)?


def _round_up(x, m):
    return ((x + m - 1) // m) * m


def _cdiv(a, b):
    return (a + b - 1) // b


def _default_bf16_epilogue():
    # bf16 VPU/EUP paths exist on v6e / v7x; keep the f32 epilogue on v5e & older.
    try:
        kind = jax.devices()[0].device_kind.lower()
    except Exception:
        return False
    return ("v6" in kind) or ("v7" in kind) or ("7x" in kind)


def _weight_spec(shape, index_map, single_buffer):
    """BlockSpec for grid-invariant (resident) weight/bias blocks."""
    if single_buffer:
        # constant index_map => second pipeline buffer is pure VMEM waste
        return pl.BlockSpec(shape, index_map, pipeline_mode=pl.Buffered(1))
    return pl.BlockSpec(shape, index_map)


def _generator_kernel(idx_ref, content_ref, w1_ref, b1_ref, w2_ref, b2_ref,
                      o_ref, x_vmem, sem, *, row_tile, bf16_epilogue):
    # Fused row gather: DMA the selected content rows (f32, HBM) into the
    # VMEM scratch tile, then run the 2-layer tanh MLP on the bf16 MXU with
    # f32 accumulation.
    base = pl.program_id(0) * row_tile

    @pl.loop(0, row_tile)
    def _issue(r):
        pltpu.make_async_copy(
            content_ref.at[idx_ref[base + r]], x_vmem.at[r], sem.at[0]
        ).start()

    @pl.loop(0, row_tile)
    def _drain(r):
        # all copies share one sem and have identical shapes -> wait per copy
        pltpu.make_async_copy(content_ref.at[0], x_vmem.at[r], sem.at[0]).wait()

    x = x_vmem[...].astype(jnp.bfloat16)          # bf16 cast in-kernel
    h = jnp.dot(x, w1_ref[...], preferred_element_type=jnp.float32) + b1_ref[...]
    if bf16_epilogue:
        # v6e / v7x: bf16 tanh halves EUP work and feeds the 2nd matmul directly
        h = jnp.tanh(h.astype(jnp.bfloat16))
        o = jnp.dot(h, w2_ref[...], preferred_element_type=jnp.float32) + b2_ref[...]
        o_ref[...] = jnp.tanh(o.astype(jnp.bfloat16)).astype(o_ref.dtype)
    else:
        # v5e-safe: bias-add / tanh stay f32 (no bf16 VPU/EUP there)
        h = jnp.tanh(h)
        o = jnp.dot(h.astype(jnp.bfloat16), w2_ref[...],
                    preferred_element_type=jnp.float32) + b2_ref[...]
        o_ref[...] = jnp.tanh(o).astype(o_ref.dtype)


@functools.partial(
    jax.jit,
    static_argnames=("emb_out", "bf16_epilogue", "single_buffer_weights"),
)
def _generator_impl(idx, content_p, w1_p, b1_p, w2_p, b2_p, *,
                    emb_out, bf16_epilogue, single_buffer_weights):
    """gather(content_p, idx) -> 2-layer tanh MLP, fused into one Pallas kernel.

    content_p: [rows, c_p] f32 (feature dim pre-padded to a 128 multiple)
    w1_p: [c_p, h_p] bf16   b1_p: [1, h_p] f32
    w2_p: [h_p, e_p] bf16   b2_p: [1, e_p] f32
    returns: [len(idx), emb_out] f32
    """
    n = idx.shape[0]
    c_p = content_p.shape[1]
    h_p = w1_p.shape[1]
    e_p = w2_p.shape[1]

    # Balanced row tiling; >=2 grid steps when possible so v7x's 2 TensorCores
    # both get work, and per-tile padding waste is bounded to < 16 rows.
    num_tiles = max(_cdiv(n, _MAX_ROW_TILE), 2 if n > 16 else 1)
    row_tile = _round_up(_cdiv(n, num_tiles), 16)
    n_p = _round_up(n, row_tile)
    grid = (n_p // row_tile,)

    # padded indices point at row 0 (valid); their outputs are sliced off
    idx_p = jnp.pad(idx.astype(jnp.int32), (0, n_p - n))

    # VMEM budget from the actual buffers (+50% headroom), sensible caps.
    vmem_bytes = (
        row_tile * c_p * 4                  # f32 gather scratch (single buffer)
        + (1 if single_buffer_weights else 2) * (c_p * h_p + h_p * e_p) * 2  # bf16 weights
        + (h_p + e_p) * 4                   # f32 biases
        + 2 * row_tile * e_p * 2            # double-buffered bf16 output tile
        + row_tile * h_p * 4                # f32 intermediate h tile
    )
    vmem_limit = min(max(int(vmem_bytes * 1.5) + (4 << 20), 16 << 20), 96 << 20)

    cost = pl.CostEstimate(
        flops=int(2 * n_p * (c_p * h_p + h_p * e_p)),
        transcendentals=int(n_p * (h_p + e_p)),
        bytes_accessed=int(
            4 * n_p * c_p                   # gathered f32 content rows
            + 2 * (c_p * h_p + h_p * e_p)   # bf16 weights (read once)
            + 4 * (h_p + e_p)               # f32 biases
            + 2 * n_p * e_p                 # bf16 output
        ),
    )

    kernel = functools.partial(
        _generator_kernel, row_tile=row_tile, bf16_epilogue=bf16_epilogue
    )

    # TODO(synk): for production-sized content_dim on v7x (64 MiB VMEM), add a
    #             K grid axis over c_p with an f32 VMEM accumulator
    #             (pl.when init/finalize) and double-buffer the gather scratch.
    out = pl.pallas_call(
        kernel,
        out_shape=jax.ShapeDtypeStruct((n_p, e_p), jnp.bfloat16),
        grid_spec=pltpu.PrefetchScalarGridSpec(
            num_scalar_prefetch=1,                       # idx -> SMEM
            grid=grid,
            in_specs=[
                pl.BlockSpec(memory_space=pl.ANY),        # content stays in HBM
                _weight_spec((c_p, h_p), lambda i, idx: (0, 0), single_buffer_weights),
                _weight_spec((1, h_p), lambda i, idx: (0, 0), single_buffer_weights),
                _weight_spec((h_p, e_p), lambda i, idx: (0, 0), single_buffer_weights),
                _weight_spec((1, e_p), lambda i, idx: (0, 0), single_buffer_weights),
            ],
            out_specs=pl.BlockSpec((row_tile, e_p), lambda i, idx: (i, 0)),
            scratch_shapes=[
                pltpu.VMEM((row_tile, c_p), jnp.float32),  # gathered content rows
                pltpu.SemaphoreType.DMA((1,)),             # shared gather semaphore
            ],
        ),
        compiler_params=pltpu.CompilerParams(
            dimension_semantics=("parallel",),
            vmem_limit_bytes=vmem_limit,
        ),
        cost_estimate=cost,
    )(idx_p, content_p, w1_p, b1_p, w2_p, b2_p)

    return out[:n, :emb_out].astype(jnp.float32)


def generator_from_indices(idx, content_p, w1_p, b1_p, w2_p, b2_p, *,
                           emb_out, bf16_epilogue=False):
    """Public entry: probes once whether single-buffered weight BlockSpecs
    (pl.Buffered(1)) compile on this jax/libtpu; falls back gracefully."""
    global _SINGLE_BUFFER_WEIGHTS
    if _SINGLE_BUFFER_WEIGHTS is None:
        try:
            out = _generator_impl(idx, content_p, w1_p, b1_p, w2_p, b2_p,
                                  emb_out=emb_out, bf16_epilogue=bf16_epilogue,
                                  single_buffer_weights=True)
            _SINGLE_BUFFER_WEIGHTS = True
            return out
        except Exception:
            _SINGLE_BUFFER_WEIGHTS = False
    return _generator_impl(idx, content_p, w1_p, b1_p, w2_p, b2_p,
                           emb_out=emb_out, bf16_epilogue=bf16_epilogue,
                           single_buffer_weights=_SINGLE_BUFFER_WEIGHTS)


class GARLearnerJAX:
    """JAX/Pallas port of GAR_Learner (cold_object='item').

    Parameters are initialized deterministically in-script (no .pt loading).
    """

    def __init__(self, key, n_users, n_items, content_dim, emb_size):
        self.latent_size = emb_size
        self.content_dim = content_dim
        hidden = 2 * emb_size

        k = jax.random.split(key, 7)
        # frozen content (item_content in the reference module)
        self.item_content = jax.random.normal(k[0], (n_items, content_dim), jnp.float32)

        # generator params (PyTorch Linear: y = x @ W^T + b, W is [out, in]);
        # we store W^T directly, i.e. [in, out], with U(-1/sqrt(in), 1/sqrt(in)) init.
        def linear_init(kw, kb, fan_in, fan_out):
            bound = 1.0 / jnp.sqrt(fan_in)
            w_t = jax.random.uniform(kw, (fan_in, fan_out), jnp.float32, -bound, bound)
            b = jax.random.uniform(kb, (fan_out,), jnp.float32, -bound, bound)
            return w_t, b

        self.w1_t, self.b1 = linear_init(k[1], k[2], content_dim, hidden)
        self.w2_t, self.b2 = linear_init(k[3], k[4], hidden, emb_size)

        # pretrained embedding tables (stand-in for the torch.load'ed tensors)
        self.user_emb = jax.random.normal(k[5], (n_users, emb_size), jnp.float32)
        self.item_emb = jax.random.normal(k[6], (n_items, emb_size), jnp.float32)

        # ---- one-time kernel-side prep (hoisted out of the per-call path) ----
        self._c_p = _round_up(content_dim, 128)
        self._h_p = _round_up(hidden, 128)
        self._e_p = _round_up(emb_size, 128)
        self._bf16_epi = _default_bf16_epilogue()

        # feature-padded f32 content (rows gathered by DMA inside the kernel)
        self._content_p = jnp.pad(
            self.item_content, ((0, 0), (0, self._c_p - content_dim)))
        # lane-dense bf16 weights, f32 biases — padded/cast exactly once
        self._w1_p = jnp.pad(
            self.w1_t, ((0, self._c_p - content_dim), (0, self._h_p - hidden))
        ).astype(jnp.bfloat16)
        self._w2_p = jnp.pad(
            self.w2_t, ((0, self._h_p - hidden), (0, self._e_p - emb_size))
        ).astype(jnp.bfloat16)
        self._b1_p = jnp.pad(self.b1, (0, self._h_p - hidden)).reshape(1, self._h_p)
        self._b2_p = jnp.pad(self.b2, (0, self._e_p - emb_size)).reshape(1, self._e_p)
        (self._content_p, self._w1_p, self._w2_p, self._b1_p, self._b2_p) = (
            jax.block_until_ready(
                (self._content_p, self._w1_p, self._w2_p, self._b1_p, self._b2_p)))

    # forward(): returns the embedding tables verbatim (pure glue, no kernel)
    def forward(self):
        return self.user_emb, self.item_emb

    def _generate(self, idx):
        return generator_from_indices(
            idx, self._content_p, self._w1_p, self._b1_p, self._w2_p, self._b2_p,
            emb_out=self.latent_size, bf16_epilogue=self._bf16_epi)

    def generator(self, x):
        # generic path for raw content rows: treat x as a temporary content table
        idx = jnp.arange(x.shape[0], dtype=jnp.int32)
        x_p = jnp.pad(x, ((0, 0), (0, self._c_p - x.shape[1])))
        return generator_from_indices(
            idx, x_p, self._w1_p, self._b1_p, self._w2_p, self._b2_p,
            emb_out=self.latent_size, bf16_epilogue=self._bf16_epi)

    def generate_item_emb(self, gen_idx):
        # row gather is fused into the kernel (scalar-prefetched indices + DMA)
        return self._generate(gen_idx)

    def get_training_embs(self, uid, iid, nid):
        user_emb = self.user_emb[uid]
        pos_item_emb = self.item_emb[iid]
        neg_item_emb = self.item_emb[nid]
        gen_emb = self._generate(iid)
        return user_emb, pos_item_emb, neg_item_emb, gen_emb


def _reference_generator(x, w1_t, b1, w2_t, b2):
    h = jnp.tanh(x @ w1_t + b1)
    return jnp.tanh(h @ w2_t + b2)


if __name__ == "__main__":
    key = jax.random.PRNGKey(0)
    n_users, n_items = 32, 64
    content_dim, emb_size = 32, 16

    model = GARLearnerJAX(key, n_users, n_items, content_dim, emb_size)

    # forward(): embedding tables
    user_emb, item_emb = model.forward()
    assert user_emb.shape == (n_users, emb_size)
    assert item_emb.shape == (n_items, emb_size)

    # generator over a contiguous batch of item indices
    gen_idx = jnp.arange(16, dtype=jnp.int32)
    gen_out = jax.block_until_ready(model.generate_item_emb(gen_idx))
    ref = _reference_generator(
        model.item_content[gen_idx], model.w1_t, model.b1, model.w2_t, model.b2)
    assert gen_out.shape == (16, emb_size)
    assert jnp.allclose(gen_out, ref, atol=2e-2, rtol=2e-2), (
        float(jnp.max(jnp.abs(gen_out - ref))))

    # non-contiguous gather check (exercises the in-kernel DMA gather)
    gen_idx2 = jnp.array([3, 60, 7, 41, 0, 22, 13, 55], dtype=jnp.int32)
    out2 = jax.block_until_ready(model.generate_item_emb(gen_idx2))
    ref2 = _reference_generator(
        model.item_content[gen_idx2], model.w1_t, model.b1, model.w2_t, model.b2)
    assert out2.shape == (8, emb_size)
    assert jnp.allclose(out2, ref2, atol=2e-2, rtol=2e-2), (
        float(jnp.max(jnp.abs(out2 - ref2))))

    # training-path embeddings (gather glue + fused kernel for gen_emb)
    uid = jnp.arange(8, dtype=jnp.int32)
    iid = jnp.arange(8, dtype=jnp.int32)
    nid = jnp.arange(8, 16, dtype=jnp.int32)
    u, p, ng, g = model.get_training_embs(uid, iid, nid)
    g = jax.block_until_ready(g)
    ref_g = _reference_generator(
        model.item_content[iid], model.w1_t, model.b1, model.w2_t, model.b2)
    assert u.shape == (8, emb_size) and p.shape == (8, emb_size) and ng.shape == (8, emb_size)
    assert g.shape == (8, emb_size)
    assert jnp.allclose(g, ref_g, atol=2e-2, rtol=2e-2)

    print("KERNEL_OK")
</pallas_src>

<mosaic_0001>
module attributes {stable_mosaic.version = 11 : i64} {
  func.func @_generator_kernel(%arg0: i32, %arg1: memref<16xi32, #tpu.memory_space<smem>>, %arg2: memref<64x128xf32, #tpu.memory_space<any>>, %arg3: memref<128x128xbf16, #tpu.memory_space<vmem>>, %arg4: memref<1x128xf32, #tpu.memory_space<vmem>>, %arg5: memref<128x128xbf16, #tpu.memory_space<vmem>>, %arg6: memref<1x128xf32, #tpu.memory_space<vmem>>, %arg7: memref<16x128xbf16, #tpu.memory_space<vmem>>, %arg8: memref<16x128xf32, #tpu.memory_space<vmem>>, %arg9: memref<1x!tpu.dma_semaphore, #tpu.memory_space<semaphore_mem>>) attributes {dimension_semantics = [#tpu.dimension_semantics<parallel>], iteration_bounds = array<i64: 1>, scalar_prefetch = 1 : i64, scratch_operands = 2 : i64, tpu.core_type = #tpu.core_type<tc>, window_params = [{}, {pipeline_mode = #tpu.pipeline_mode<synchronous>, transform_indices = @transform_1, window_bounds = array<i64: 128, 128>}, {pipeline_mode = #tpu.pipeline_mode<synchronous>, transform_indices = @transform_2, window_bounds = array<i64: 1, 128>}, {pipeline_mode = #tpu.pipeline_mode<synchronous>, transform_indices = @transform_3, window_bounds = array<i64: 128, 128>}, {pipeline_mode = #tpu.pipeline_mode<synchronous>, transform_indices = @transform_4, window_bounds = array<i64: 1, 128>}, {transform_indices = @transform_5, window_bounds = array<i64: 16, 128>}]} {
    %c16_i32 = arith.constant 16 : i32
    %0 = arith.muli %arg0, %c16_i32 : i32
    %c0_i32 = arith.constant 0 : i32
    %c16_i32_0 = arith.constant 16 : i32
    %1 = arith.addi %c0_i32, %c16_i32_0 : i32
    %c1_i32 = arith.constant 1 : i32
    scf.for %arg10 = %c0_i32 to %1 step %c1_i32  : i32 {
      %c1_i32_18 = arith.constant 1 : i32
      %20 = arith.muli %arg10, %c1_i32_18 : i32
      %c0_i32_19 = arith.constant 0 : i32
      %21 = arith.addi %c0_i32_19, %20 : i32
      %22 = arith.addi %0, %21 : i32
      %23 = arith.index_cast %22 : i32 to index
      %24 = memref.load %arg1[%23] : memref<16xi32, #tpu.memory_space<smem>>
      %c0_i32_20 = arith.constant 0 : i32
      %c0_i32_21 = arith.constant 0 : i32
      %25 = tpu.memref_slice %arg2[%24, %c0_i32_21] : memref<64x128xf32, #tpu.memory_space<any>> -> memref<1x128xf32, #tpu.memory_space<any>>
      %26 = tpu.memref_squeeze %25 : memref<1x128xf32, #tpu.memory_space<any>> -> memref<128xf32, #tpu.memory_space<any>>
      %c0_i32_22 = arith.constant 0 : i32
      %27 = tpu.memref_slice %arg8[%21, %c0_i32_22] : memref<16x128xf32, #tpu.memory_space<vmem>> -> memref<1x128xf32, #tpu.memory_space<vmem>>
      %28 = tpu.memref_squeeze %27 : memref<1x128xf32, #tpu.memory_space<vmem>> -> memref<128xf32, #tpu.memory_space<vmem>>
      %29 = tpu.memref_slice %arg9[%c0_i32_20] : memref<1x!tpu.dma_semaphore, #tpu.memory_space<semaphore_mem>> -> memref<1x!tpu.dma_semaphore, #tpu.memory_space<semaphore_mem>>
      %30 = tpu.memref_squeeze %29 : memref<1x!tpu.dma_semaphore, #tpu.memory_space<semaphore_mem>> -> memref<!tpu.dma_semaphore, #tpu.memory_space<semaphore_mem>>
      tpu.enqueue_dma source(%26 : memref<128xf32, #tpu.memory_space<any>>) target(%28 : memref<128xf32, #tpu.memory_space<vmem>>) target_semaphore(%30 : memref<!tpu.dma_semaphore, #tpu.memory_space<semaphore_mem>>)
    }
    %c16_i32_1 = arith.constant 16 : i32
    %c0_i32_2 = arith.constant 0 : i32
    %c16_i32_3 = arith.constant 16 : i32
    %2 = arith.addi %c0_i32_2, %c16_i32_3 : i32
    %c1_i32_4 = arith.constant 1 : i32
    scf.for %arg10 = %c0_i32_2 to %2 step %c1_i32_4  : i32 {
      %c1_i32_18 = arith.constant 1 : i32
      %20 = arith.muli %arg10, %c1_i32_18 : i32
      %c0_i32_19 = arith.constant 0 : i32
      %21 = arith.addi %c0_i32_19, %20 : i32
      %c0_i32_20 = arith.constant 0 : i32
      %c0_i32_21 = arith.constant 0 : i32
      %c0_i32_22 = arith.constant 0 : i32
      %22 = tpu.memref_slice %arg2[%c0_i32_20, %c0_i32_22] : memref<64x128xf32, #tpu.memory_space<any>> -> memref<1x128xf32, #tpu.memory_space<any>>
      %23 = tpu.memref_squeeze %22 : memref<1x128xf32, #tpu.memory_space<any>> -> memref<128xf32, #tpu.memory_space<any>>
      %c0_i32_23 = arith.constant 0 : i32
      %24 = tpu.memref_slice %arg8[%21, %c0_i32_23] : memref<16x128xf32, #tpu.memory_space<vmem>> -> memref<1x128xf32, #tpu.memory_space<vmem>>
      %25 = tpu.memref_squeeze %24 : memref<1x128xf32, #tpu.memory_space<vmem>> -> memref<128xf32, #tpu.memory_space<vmem>>
      %26 = tpu.memref_slice %arg9[%c0_i32_21] : memref<1x!tpu.dma_semaphore, #tpu.memory_space<semaphore_mem>> -> memref<1x!tpu.dma_semaphore, #tpu.memory_space<semaphore_mem>>
      %27 = tpu.memref_squeeze %26 : memref<1x!tpu.dma_semaphore, #tpu.memory_space<semaphore_mem>> -> memref<!tpu.dma_semaphore, #tpu.memory_space<semaphore_mem>>
      tpu.wait_dma2 semaphore(%27 : memref<!tpu.dma_semaphore, #tpu.memory_space<semaphore_mem>>) src(%23 : memref<128xf32, #tpu.memory_space<any>>) dst(%25 : memref<128xf32, #tpu.memory_space<vmem>>)
    }
    %c16_i32_5 = arith.constant 16 : i32
    %c0 = arith.constant 0 : index
    %c0_6 = arith.constant 0 : index
    %3 = vector.load %arg8[%c0, %c0_6] : memref<16x128xf32, #tpu.memory_space<vmem>>, vector<16x128xf32>
    %4 = arith.truncf %3 : vector<16x128xf32> to vector<16x128xbf16>
    %c0_7 = arith.constant 0 : index
    %c0_8 = arith.constant 0 : index
    %5 = vector.load %arg3[%c0_7, %c0_8] : memref<128x128xbf16, #tpu.memory_space<vmem>>, vector<128x128xbf16>
    %cst = arith.constant dense<0.000000e+00> : vector<16x128xf32>
    %6 = tpu.matmul %4, %5, %cst {dimension_numbers = #tpu.dot_dimension_numbers<[1], [0], [0], [1], [0, 0, 1, 1], [], []>} : vector<16x128xbf16>, vector<128x128xbf16>, vector<16x128xf32> -> vector<16x128xf32>
    %c0_9 = arith.constant 0 : index
    %c0_10 = arith.constant 0 : index
    %7 = vector.load %arg4[%c0_9, %c0_10] : memref<1x128xf32, #tpu.memory_space<vmem>>, vector<1x128xf32>
    %8 = vector.broadcast %7 : vector<1x128xf32> to vector<16x128xf32>
    %9 = arith.addf %6, %8 : vector<16x128xf32>
    %10 = math.tanh %9 : vector<16x128xf32>
    %11 = arith.truncf %10 : vector<16x128xf32> to vector<16x128xbf16>
    %c0_11 = arith.constant 0 : index
    %c0_12 = arith.constant 0 : index
    %12 = vector.load %arg5[%c0_11, %c0_12] : memref<128x128xbf16, #tpu.memory_space<vmem>>, vector<128x128xbf16>
    %cst_13 = arith.constant dense<0.000000e+00> : vector<16x128xf32>
    %13 = tpu.matmul %11, %12, %cst_13 {dimension_numbers = #tpu.dot_dimension_numbers<[1], [0], [0], [1], [0, 0, 1, 1], [], []>} : vector<16x128xbf16>, vector<128x128xbf16>, vector<16x128xf32> -> vector<16x128xf32>
    %c0_14 = arith.constant 0 : index
    %c0_15 = arith.constant 0 : index
    %14 = vector.load %arg6[%c0_14, %c0_15] : memref<1x128xf32, #tpu.memory_space<vmem>>, vector<1x128xf32>
    %15 = vector.broadcast %14 : vector<1x128xf32> to vector<16x128xf32>
    %16 = arith.addf %13, %15 : vector<16x128xf32>
    %17 = math.tanh %16 : vector<16x128xf32>
    %18 = arith.truncf %17 : vector<16x128xf32> to vector<16x128xbf16>
    %c0_16 = arith.constant 0 : index
    %c0_17 = arith.constant 0 : index
    %19 = vector.load %arg7[%c0_16, %c0_17] : memref<16x128xbf16, #tpu.memory_space<vmem>>, vector<16x128xbf16>
    tpu.vector_store %arg7[%c0_16, %c0_17], %18 {strides = array<i32>} : memref<16x128xbf16, #tpu.memory_space<vmem>>, vector<16x128xbf16>,
    return
  }
  func.func @transform_1(%arg0: i32, %arg1: memref<16xi32, #tpu.memory_space<smem>>) -> (i32, i32) {
    %c0_i32 = arith.constant 0 : i32
    %c0_i32_0 = arith.constant 0 : i32
    %c0_i32_1 = arith.constant 0 : i32
    return %c0_i32, %c0_i32_0 : i32, i32
  }
  func.func @transform_2(%arg0: i32, %arg1: memref<16xi32, #tpu.memory_space<smem>>) -> (i32, i32) {
    %c0_i32 = arith.constant 0 : i32
    %c0_i32_0 = arith.constant 0 : i32
    %c0_i32_1 = arith.constant 0 : i32
    return %c0_i32, %c0_i32_0 : i32, i32
  }
  func.func @transform_3(%arg0: i32, %arg1: memref<16xi32, #tpu.memory_space<smem>>) -> (i32, i32) {
    %c0_i32 = arith.constant 0 : i32
    %c0_i32_0 = arith.constant 0 : i32
    %c0_i32_1 = arith.constant 0 : i32
    return %c0_i32, %c0_i32_0 : i32, i32
  }
  func.func @transform_4(%arg0: i32, %arg1: memref<16xi32, #tpu.memory_space<smem>>) -> (i32, i32) {
    %c0_i32 = arith.constant 0 : i32
    %c0_i32_0 = arith.constant 0 : i32
    %c0_i32_1 = arith.constant 0 : i32
    return %c0_i32, %c0_i32_0 : i32, i32
  }
  func.func @transform_5(%arg0: i32, %arg1: memref<16xi32, #tpu.memory_space<smem>>) -> (i32, i32) {
    %c0_i32 = arith.constant 0 : i32
    %c0_i32_0 = arith.constant 0 : i32
    return %arg0, %c0_i32 : i32, i32
  }
}

module attributes {stable_mosaic.version = 11 : i64} {
  func.func @_generator_kernel(%arg0: i32, %arg1: memref<16xi32, #tpu.memory_space<smem>>, %arg2: memref<64x128xf32, #tpu.memory_space<any>>, %arg3: memref<128x128xbf16, #tpu.memory_space<vmem>>, %arg4: memref<1x128xf32, #tpu.memory_space<vmem>>, %arg5: memref<128x128xbf16, #tpu.memory_space<vmem>>, %arg6: memref<1x128xf32, #tpu.memory_space<vmem>>, %arg7: memref<16x128xbf16, #tpu.memory_space<vmem>>, %arg8: memref<16x128xf32, #tpu.memory_space<vmem>>, %arg9: memref<1x!tpu.dma_semaphore, #tpu.memory_space<semaphore_mem>>) attributes {dimension_semantics = [#tpu.dimension_semantics<parallel>], iteration_bounds = array<i64: 1>, scalar_prefetch = 1 : i64, scratch_operands = 2 : i64, tpu.core_type = #tpu.core_type<tc>, window_params = [{}, {pipeline_mode = #tpu.pipeline_mode<synchronous>, transform_indices = @transform_1, window_bounds = array<i64: 128, 128>}, {pipeline_mode = #tpu.pipeline_mode<synchronous>, transform_indices = @transform_2, window_bounds = array<i64: 1, 128>}, {pipeline_mode = #tpu.pipeline_mode<synchronous>, transform_indices = @transform_3, window_bounds = array<i64: 128, 128>}, {pipeline_mode = #tpu.pipeline_mode<synchronous>, transform_indices = @transform_4, window_bounds = array<i64: 1, 128>}, {transform_indices = @transform_5, window_bounds = array<i64: 16, 128>}]} {
    %c16_i32 = arith.constant 16 : i32
    %0 = arith.muli %arg0, %c16_i32 : i32
    %c0_i32 = arith.constant 0 : i32
    %c16_i32_0 = arith.constant 16 : i32
    %1 = arith.addi %c0_i32, %c16_i32_0 : i32
    %c1_i32 = arith.constant 1 : i32
    scf.for %arg10 = %c0_i32 to %1 step %c1_i32  : i32 {
      %c1_i32_18 = arith.constant 1 : i32
      %20 = arith.muli %arg10, %c1_i32_18 : i32
      %c0_i32_19 = arith.constant 0 : i32
      %21 = arith.addi %c0_i32_19, %20 : i32
      %22 = arith.addi %0, %21 : i32
      %23 = arith.index_cast %22 : i32 to index
      %24 = memref.load %arg1[%23] : memref<16xi32, #tpu.memory_space<smem>>
      %c0_i32_20 = arith.constant 0 : i32
      %c0_i32_21 = arith.constant 0 : i32
      %25 = tpu.memref_slice %arg2[%24, %c0_i32_21] : memref<64x128xf32, #tpu.memory_space<any>> -> memref<1x128xf32, #tpu.memory_space<any>>
      %26 = tpu.memref_squeeze %25 : memref<1x128xf32, #tpu.memory_space<any>> -> memref<128xf32, #tpu.memory_space<any>>
      %c0_i32_22 = arith.constant 0 : i32
      %27 = tpu.memref_slice %arg8[%21, %c0_i32_22] : memref<16x128xf32, #tpu.memory_space<vmem>> -> memref<1x128xf32, #tpu.memory_space<vmem>>
      %28 = tpu.memref_squeeze %27 : memref<1x128xf32, #tpu.memory_space<vmem>> -> memref<128xf32, #tpu.memory_space<vmem>>
      %29 = tpu.memref_slice %arg9[%c0_i32_20] : memref<1x!tpu.dma_semaphore, #tpu.memory_space<semaphore_mem>> -> memref<1x!tpu.dma_semaphore, #tpu.memory_space<semaphore_mem>>
      %30 = tpu.memref_squeeze %29 : memref<1x!tpu.dma_semaphore, #tpu.memory_space<semaphore_mem>> -> memref<!tpu.dma_semaphore, #tpu.memory_space<semaphore_mem>>
      tpu.enqueue_dma source(%26 : memref<128xf32, #tpu.memory_space<any>>) target(%28 : memref<128xf32, #tpu.memory_space<vmem>>) target_semaphore(%30 : memref<!tpu.dma_semaphore, #tpu.memory_space<semaphore_mem>>)
    }
    %c16_i32_1 = arith.constant 16 : i32
    %c0_i32_2 = arith.constant 0 : i32
    %c16_i32_3 = arith.constant 16 : i32
    %2 = arith.addi %c0_i32_2, %c16_i32_3 : i32
    %c1_i32_4 = arith.constant 1 : i32
    scf.for %arg10 = %c0_i32_2 to %2 step %c1_i32_4  : i32 {
      %c1_i32_18 = arith.constant 1 : i32
      %20 = arith.muli %arg10, %c1_i32_18 : i32
      %c0_i32_19 = arith.constant 0 : i32
      %21 = arith.addi %c0_i32_19, %20 : i32
      %c0_i32_20 = arith.constant 0 : i32
      %c0_i32_21 = arith.constant 0 : i32
      %c0_i32_22 = arith.constant 0 : i32
      %22 = tpu.memref_slice %arg2[%c0_i32_20, %c0_i32_22] : memref<64x128xf32, #tpu.memory_space<any>> -> memref<1x128xf32, #tpu.memory_space<any>>
      %23 = tpu.memref_squeeze %22 : memref<1x128xf32, #tpu.memory_space<any>> -> memref<128xf32, #tpu.memory_space<any>>
      %c0_i32_23 = arith.constant 0 : i32
      %24 = tpu.memref_slice %arg8[%21, %c0_i32_23] : memref<16x128xf32, #tpu.memory_space<vmem>> -> memref<1x128xf32, #tpu.memory_space<vmem>>
      %25 = tpu.memref_squeeze %24 : memref<1x128xf32, #tpu.memory_space<vmem>> -> memref<128xf32, #tpu.memory_space<vmem>>
      %26 = tpu.memref_slice %arg9[%c0_i32_21] : memref<1x!tpu.dma_semaphore, #tpu.memory_space<semaphore_mem>> -> memref<1x!tpu.dma_semaphore, #tpu.memory_space<semaphore_mem>>
      %27 = tpu.memref_squeeze %26 : memref<1x!tpu.dma_semaphore, #tpu.memory_space<semaphore_mem>> -> memref<!tpu.dma_semaphore, #tpu.memory_space<semaphore_mem>>
      tpu.wait_dma2 semaphore(%27 : memref<!tpu.dma_semaphore, #tpu.memory_space<semaphore_mem>>) src(%23 : memref<128xf32, #tpu.memory_space<any>>) dst(%25 : memref<128xf32, #tpu.memory_space<vmem>>)
    }
    %c16_i32_5 = arith.constant 16 : i32
    %c0 = arith.constant 0 : index
    %c0_6 = arith.constant 0 : index
    %3 = vector.load %arg8[%c0, %c0_6] : memref<16x128xf32, #tpu.memory_space<vmem>>, vector<16x128xf32>
    %4 = arith.truncf %3 : vector<16x128xf32> to vector<16x128xbf16>
    %c0_7 = arith.constant 0 : index
    %c0_8 = arith.constant 0 : index
    %5 = vector.load %arg3[%c0_7, %c0_8] : memref<128x128xbf16, #tpu.memory_space<vmem>>, vector<128x128xbf16>
    %cst = arith.constant dense<0.000000e+00> : vector<16x128xf32>
    %6 = tpu.matmul %4, %5, %cst {dimension_numbers = #tpu.dot_dimension_numbers<[1], [0], [0], [1], [0, 0, 1, 1], [], []>} : vector<16x128xbf16>, vector<128x128xbf16>, vector<16x128xf32> -> vector<16x128xf32>
    %c0_9 = arith.constant 0 : index
    %c0_10 = arith.constant 0 : index
    %7 = vector.load %arg4[%c0_9, %c0_10] : memref<1x128xf32, #tpu.memory_space<vmem>>, vector<1x128xf32>
    %8 = vector.broadcast %7 : vector<1x128xf32> to vector<16x128xf32>
    %9 = arith.addf %6, %8 : vector<16x128xf32>
    %10 = math.tanh %9 : vector<16x128xf32>
    %11 = arith.truncf %10 : vector<16x128xf32> to vector<16x128xbf16>
    %c0_11 = arith.constant 0 : index
    %c0_12 = arith.constant 0 : index
    %12 = vector.load %arg5[%c0_11, %c0_12] : memref<128x128xbf16, #tpu.memory_space<vmem>>, vector<128x128xbf16>
    %cst_13 = arith.constant dense<0.000000e+00> : vector<16x128xf32>
    %13 = tpu.matmul %11, %12, %cst_13 {dimension_numbers = #tpu.dot_dimension_numbers<[1], [0], [0], [1], [0, 0, 1, 1], [], []>} : vector<16x128xbf16>, vector<128x128xbf16>, vector<16x128xf32> -> vector<16x128xf32>
    %c0_14 = arith.constant 0 : index
    %c0_15 = arith.constant 0 : index
    %14 = vector.load %arg6[%c0_14, %c0_15] : memref<1x128xf32, #tpu.memory_space<vmem>>, vector<1x128xf32>
    %15 = vector.broadcast %14 : vector<1x128xf32> to vector<16x128xf32>
    %16 = arith.addf %13, %15 : vector<16x128xf32>
    %17 = math.tanh %16 : vector<16x128xf32>
    %18 = arith.truncf %17 : vector<16x128xf32> to vector<16x128xbf16>
    %c0_16 = arith.constant 0 : index
    %c0_17 = arith.constant 0 : index
    %19 = vector.load %arg7[%c0_16, %c0_17] : memref<16x128xbf16, #tpu.memory_space<vmem>>, vector<16x128xbf16>
    tpu.vector_store %arg7[%c0_16, %c0_17], %18 {strides = array<i32>} : memref<16x128xbf16, #tpu.memory_space<vmem>>, vector<16x128xbf16>,
    return
  }
  func.func @transform_1(%arg0: i32, %arg1: memref<16xi32, #tpu.memory_space<smem>>) -> (i32, i32) {
    %c0_i32 = arith.constant 0 : i32
    %c0_i32_0 = arith.constant 0 : i32
    %c0_i32_1 = arith.constant 0 : i32
    return %c0_i32, %c0_i32_0 : i32, i32
  }
  func.func @transform_2(%arg0: i32, %arg1: memref<16xi32, #tpu.memory_space<smem>>) -> (i32, i32) {
    %c0_i32 = arith.constant 0 : i32
    %c0_i32_0 = arith.constant 0 : i32
    %c0_i32_1 = arith.constant 0 : i32
    return %c0_i32, %c0_i32_0 : i32, i32
  }
  func.func @transform_3(%arg0: i32, %arg1: memref<16xi32, #tpu.memory_space<smem>>) -> (i32, i32) {
    %c0_i32 = arith.constant 0 : i32
    %c0_i32_0 = arith.constant 0 : i32
    %c0_i32_1 = arith.constant 0 : i32
    return %c0_i32, %c0_i32_0 : i32, i32
  }
  func.func @transform_4(%arg0: i32, %arg1: memref<16xi32, #tpu.memory_space<smem>>) -> (i32, i32) {
    %c0_i32 = arith.constant 0 : i32
    %c0_i32_0 = arith.constant 0 : i32
    %c0_i32_1 = arith.constant 0 : i32
    return %c0_i32, %c0_i32_0 : i32, i32
  }
  func.func @transform_5(%arg0: i32, %arg1: memref<16xi32, #tpu.memory_space<smem>>) -> (i32, i32) {
    %c0_i32 = arith.constant 0 : i32
    %c0_i32_0 = arith.constant 0 : i32
    return %arg0, %c0_i32 : i32, i32
  }
}

</mosaic_0001>

<bundles_post_ra>
// kernel: _generator_impl.1
= control target key start
LH: loop header
LB: loop body
LE: loop exit
PB: predicated region body
PF: predicated region fallthrough
CT: control target
= control target key end

     0   :  { %s693_s0 = inlined_call_operand.hbm [shape: s32[16], index: 0, kind: input, shape index: {}]   ;;  %s694_s1 = inlined_call_operand.hbm [shape: f32[64,128], index: 1, kind: input, shape index: {}]   ;;  %s695_s2 = inlined_call_operand.hbm [shape: bf16[128,128], index: 2, kind: input, shape index: {}]   ;;  %s696_s3 = inlined_call_operand.vmem [shape: f32[1,128], index: 3, kind: input, shape index: {}]   ;;  %s697_s4 = inlined_call_operand.hbm [shape: bf16[128,128], index: 4, kind: input, shape index: {}]   ;;  %s698_s5 = inlined_call_operand.vmem [shape: f32[1,128], index: 5, kind: input, shape index: {}]   ;;  %s699_s6 = inlined_call_operand.vmem [shape: bf16[16,128], index: 6, kind: output, shape index: {}]  }
   0x1   :  { %s484_s23 = scalar_lea.hbm %s693_s0, 16 }
   0x2   :  { %p485_p0 = scmp.ne.s32.totalorder %s693_s0, %s484_s23  ;;  %p488_p1 = scmp.lt.u32.totalorder %s484_s23, %s693_s0 }
   0x4   :  { %p490_p2 = pnand %p488_p1, %p485_p0 }
   0x6   :  { %493 = shalt.err (!%p490_p2)  }
   0x7   :  { %s586_s28 = smov [#allocation5]  }
   0x8   :  { %12 = dma.hbm_to_smem %s693_s0, 16, %s586_s28, [#allocation4] }
   0x9   :  { %570 = dma.done.wait [#allocation4], 16 }
   0xa   :  { %571 = vsyncadd [#allocation4], 4294967280 }
   0xb   :  { %14 = sfence }
   0xc   :  { %15 = vsyncpa [#allocation7], 0 }
   0xd   :  { %16 = vsyncpa [#allocation9], 0  ;;  %s587_s7 = smov [#allocation6]   ;;  %s494_s11 = scalar_lea.hbm %s695_s2, 1024 }
   0xe   :  { %s22_s8 = sshll.u32 %s587_s7, 4  ;;  %p495_p3 = scmp.ne.s32.totalorder %s695_s2, %s494_s11  ;;  %s23_s8 = int_to_ptr.vmem [resolvable:$true] %s22_s8 }
   0xf   :  { %p498_p4 = scmp.lt.u32.totalorder %s494_s11, %s695_s2 }
  0x11   :  { %p500_p5 = pnand %p498_p4, %p495_p3 }
  0x13   :  { %503 = shalt.err (!%p500_p5)
}
  0x14   :  { %s504_s0 = scalar_lea.vmem %s23_s8, 1024  ;;  %p509_p7 = scmp.lt.s32.totalorder %s23_s8, %s23_s8 }
  0x15   :  { %p505_p6 = scmp.ne.s32.totalorder %s23_s8, %s504_s0  ;;  %p510_p8 = scmp.lt.s32.totalorder %s504_s0, %s504_s0 }
  0x17   :  { %p511_p9 = por %p510_p8, %p509_p7 }
  0x19   :  { %p512_p10 = pnand %p511_p9, %p505_p6 }
  0x1b   :  { %515 = shalt.err (!%p512_p10)
}
  0x1c   :  { %s588_s16 = smov 64   ;;  %s589_s17 = smov 4  }
  0x1d   :  { %28 = dma.hbm_to_vmem [thread:$0]  %s695_s2, 1024, %s23_s8, [#allocation7], %s588_s16, %s588_s16, %s589_s17  }
  0x1e   :  { %s590_s20 = smov [#allocation8]   ;;  %s516_s24 = scalar_lea.hbm %s697_s4, 1024 }
  0x1f   :  { %s36_s21 = sshll.u32 %s590_s20, 4  ;;  %p517_p11 = scmp.ne.s32.totalorder %s697_s4, %s516_s24  ;;  %s37_s21 = int_to_ptr.vmem [resolvable:$true] %s36_s21 }
  0x20   :  { %p520_p12 = scmp.lt.u32.totalorder %s516_s24, %s697_s4 }
  0x22   :  { %p522_p13 = pnand %p520_p12, %p517_p11 }
  0x24   :  { %525 = shalt.err (!%p522_p13)
}
  0x25   :  { %s526_s29 = scalar_lea.vmem %s37_s21, 1024  ;;  %p531_p1 = scmp.lt.s32.totalorder %s37_s21, %s37_s21 }
  0x26   :  { %p527_p0 = scmp.ne.s32.totalorder %s37_s21, %s526_s29  ;;  %p532_p2 = scmp.lt.s32.totalorder %s526_s29, %s526_s29 }
  0x28   :  { %p533_p3 = por %p532_p2, %p531_p1 }
  0x2a   :  { %p534_p4 = pnand %p533_p3, %p527_p0 }
  0x2c   :  { %537 = shalt.err (!%p534_p4)
}
  0x2d   :  { %42 = dma.hbm_to_vmem [thread:$0]  %s697_s4, 1024, %s37_s21, [#allocation9], %s588_s16, %s588_s16, %s589_s17  }
  0x2e   :  { %572 = dma.done.wait [#allocation7], 1024  }
  0x2f   :  { %573 = vsyncadd [#allocation7], 4294966272 }
  0x30   :  { %574 = dma.done.wait [#allocation9], 1024  }
  0x31   :  { %575 = vsyncadd [#allocation9], 4294966272  ;;  %s665_s7 = smov 0  }
  0x32 LB: > { %s60_s8 = sld [smem:[#allocation5 + %s580_s7]]  ;;  %s63_s9 = scalar_lea.vmem [#allocation2], %s580_s7  ;;  %s580_s7 = sphi %s665_s7, %s58_s7  }
  0x33   : > { %s71_s10 = sshll.u32 %s63_s9, 4  ;;  %s540_s16 = scalar_lea.hbm %s694_s1, 1024  ;;  %s72_s10 = int_to_ptr.vmem [resolvable:$true] %s71_s10 }
  0x38   : > { %s350_s11 = sshll.u32 %s60_s8, 4 }
  0x39   : > { %s62_s13 = scalar_lea.hbm %s694_s1, %s350_s11 }
  0x3a   : > { %s538_s14 = scalar_lea.hbm %s62_s13, 16  ;;  %p541_p6 = scmp.lt.u32.totalorder %s62_s13, %s694_s1 }
  0x3b   : > { %p539_p5 = scmp.ne.s32.totalorder %s62_s13, %s538_s14  ;;  %p542_p7 = scmp.lt.u32.totalorder %s540_s16, %s538_s14 }
  0x3c   : > { %p544_p9 = scmp.lt.u32.totalorder %s538_s14, %s62_s13 }
  0x3d   : > { %p543_p8 = por %p542_p7, %p541_p6 }
  0x3f   : > { %p545_p10 = por %p544_p9, %p543_p8 }
  0x41   : > { %p546_p11 = pnand %p545_p10, %p539_p5 }
  0x43   : > { %549 = shalt.err (!%p546_p11)  }
  0x44   : > { %s550_s19 = scalar_lea.vmem %s72_s10, 16  ;;  %s591_s20 = smov [#allocation2]  }
  0x45   : > { %p551_p12 = scmp.ne.s32.totalorder %s72_s10, %s550_s19  ;;  %s552_s21 = sshll.u32 %s591_s20, 4  ;;  %s553_s21 = int_to_ptr.vmem [resolvable:$false] %s552_s21 }
  0x46   : > { %s554_s22 = scalar_lea.vmem %s553_s21, 256  ;;  %p555_p13 = scmp.lt.s32.totalorder %s72_s10, %s553_s21 }
  0x47   : > { %p556_p0 = scmp.lt.s32.totalorder %s554_s22, %s550_s19 }
  0x49   : > { %p557_p1 = por %p556_p0, %p555_p13 }
  0x4b   : > { %p558_p2 = pnand %p557_p1, %p551_p12 }
  0x4d   : > { %561 = shalt.err (!%p558_p2)  }
  0x4e   : > { %74 = dma.hbm_to_vmem [thread:$0]  %s62_s13, 16, %s72_s10, [#allocation3] }
  0x4f   : > { %s58_s7 = sadd.s32 1, %s580_s7  }
  0x50   : > { %p55_p3 = scmp.ge.s32.totalorder %s58_s7, 16  }
  0x51   :  { %s582_s23 = smov (%p55_p3), 0  }
  0x52   :  { %57 = sbr.rel (!%p55_p3) target bundleno = 50 (0x32), region = 64 }
  0x59 LB: > { %576 = dma.done.wait [#allocation3], 16  ;;  %s584_s23 = sphi %s582_s23, %s80_s23  }
  0x5a   : > { %577 = vsyncadd [#allocation3], 4294967280  ;;  %s80_s23 = sadd.s32 1, %s584_s23  }
  0x5b   : > { %p77_p4 = scmp.ge.s32.totalorder %s80_s23, 16  }
  0x5c   :  { %v460_v0 = vld [vmem:[#allocation6] sm:$0xff] (%p77_p4)   ;;  %v592_v1 = vmov (%p77_p4), 0.0   ;;  %v461_v2 = vld [vmem:[#allocation6 + $0x8] sm:$0xff] (%p77_p4)   ;;  %vm593_vm0 = vmmov (%p77_p4), 0   ;;  %v462_v3 = vld [vmem:[#allocation6 + $0x10] sm:$0xff] (%p77_p4)  }
  0x5d   :  { %79 = sbr.rel (!%p77_p4) target bundleno = 89 (0x59), region = 75  ;;  %397 = vmatprep.subr.bf16.mxu0 (%p77_p4), %v592_v1  ;;  %417 = vmatprep.subr.bf16.mxu1 (%p77_p4), %v592_v1  ;;  %v468_v4 = vld [vmem:[#allocation8] sm:$0xff] (%p77_p4)   ;;  %v463_v5 = vld [vmem:[#allocation6 + $0x18] sm:$0xff] (%p77_p4)   ;;  %v469_v6 = vld [vmem:[#allocation8 + $0x8] sm:$0xff] (%p77_p4)  }
  0x5e   :  { %398 = vmatpush3.bf16.msra.mxu0 (%p77_p4), %v460_v0  ;;  %413 = vmatprep.mubr.msk.bf16.mxu0 (%p77_p4), %vm593_vm0, %v592_v1  ;;  %v464_v7 = vld [vmem:[#allocation6 + $0x20] sm:$0xff] (%p77_p4)   ;;  %v470_v8 = vld [vmem:[#allocation8 + $0x10] sm:$0xff] (%p77_p4)   ;;  %v465_v9 = vld [vmem:[#allocation6 + $0x28] sm:$0xff] (%p77_p4)  }
  0x5f   :  { %399 = vmatprep.subr.bf16.mxu0 (%p77_p4), %v592_v1  ;;  %433 = vmatprep.mubr.msk.bf16.mxu1 (%p77_p4), %vm593_vm0, %v592_v1  ;;  %v471_v10 = vld [vmem:[#allocation8 + $0x18] sm:$0xff] (%p77_p4)   ;;  %v466_v11 = vld [vmem:[#allocation6 + $0x30] sm:$0xff] (%p77_p4)   ;;  %v472_v16 = vld [vmem:[#allocation8 + $0x20] sm:$0xff] (%p77_p4)  }
  0x60   :  { %418 = vmatpush3.bf16.msra.mxu1 (%p77_p4), %v468_v4  ;;  %v467_v12 = vld [vmem:[#allocation6 + $0x38] sm:$0xff] (%p77_p4)   ;;  %v83_v13 = vld [vmem:[#allocation2] sm:$0xff] (%p77_p4)  ;;  %v473_v17 = vld [vmem:[#allocation8 + $0x28] sm:$0xff] (%p77_p4)  }
  0x61   :  { %419 = vmatprep.subr.bf16.mxu1 (%p77_p4), %v592_v1  ;;  %v84_v14 = vld [vmem:[#allocation2 + $0x8] sm:$0xff] (%p77_p4)  ;;  %v474_v18 = vld [vmem:[#allocation8 + $0x30] sm:$0xff] (%p77_p4)  }
  0x62   :  { %400 = vmatpush3.bf16.msra.mxu0 (%p77_p4), %v461_v2  ;;  %v85_v15 = vpack.c.bf16 (%p77_p4), %v84_v14, %v83_v13  ;;  %v475_v19 = vld [vmem:[#allocation8 + $0x38] sm:$0xff] (%p77_p4)   ;;  %v351_v20 = vld [vmem:[%s696_s3] ss:$0 sm:$0xff] (%p77_p4) }
  0x63   :  { %401 = vmatprep.subr.bf16.mxu0 (%p77_p4), %v592_v1  ;;  %v360_v30 = vld [vmem:[%s698_s5] ss:$0 sm:$0xff] (%p77_p4) }
  0x64   :  { %420 = vmatpush3.bf16.msra.mxu1 %v469_v6 }
  0x65   :  { %421 = vmatprep.subr.bf16.mxu1 %v592_v1 }
  0x66   :  { %402 = vmatpush3.bf16.msra.mxu0 %v462_v3 }
  0x67   :  { %403 = vmatprep.subr.bf16.mxu0 %v592_v1 }
  0x68   :  { %422 = vmatpush3.bf16.msra.mxu1 %v470_v8 }
  0x69   :  { %423 = vmatprep.subr.bf16.mxu1 %v592_v1 }
  0x6a   :  { %404 = vmatpush3.bf16.msra.mxu0 %v463_v5 }
  0x6b   :  { %405 = vmatprep.subr.bf16.mxu0 %v592_v1 }
  0x6c   :  { %424 = vmatpush3.bf16.msra.mxu1 %v471_v10 }
  0x6d   :  { %425 = vmatprep.subr.bf16.mxu1 %v592_v1 }
  0x6e   :  { %406 = vmatpush3.bf16.msra.mxu0 %v464_v7 }
  0x6f   :  { %407 = vmatprep.subr.bf16.mxu0 %v592_v1 }
  0x70   :  { %426 = vmatpush3.bf16.msra.mxu1 %v472_v16 }
  0x71   :  { %427 = vmatprep.subr.bf16.mxu1 %v592_v1 }
  0x72   :  { %408 = vmatpush3.bf16.msra.mxu0 %v465_v9 }
  0x73   :  { %409 = vmatprep.subr.bf16.mxu0 %v592_v1 }
  0x74   :  { %428 = vmatpush3.bf16.msra.mxu1 %v473_v17 }
  0x75   :  { %429 = vmatprep.subr.bf16.mxu1 %v592_v1 }
  0x76   :  { %410 = vmatpush3.bf16.msra.mxu0 %v466_v11 }
  0x77   :  { %411 = vmatprep.subr.bf16.mxu0 %v592_v1 }
  0x78   :  { %430 = vmatpush3.bf16.msra.mxu1 %v474_v18 }
  0x79   :  { %431 = vmatprep.subr.bf16.mxu1 %v592_v1 }
  0x7a   :  { %412 = vmatpush3.bf16.msra.mxu0 %v467_v12 }
  0x7c   :  { %432 = vmatpush3.bf16.msra.mxu1 %v475_v19 }
  0x7d   :  { %414 = vmatmul.mubr.bf16.vlgmr.msra.gmra.mrb[0].mxu0 %v85_v15 }
 0x150   :  { %v191_v21 = vpop.f32.mrb[0].mxu0 }
 0x151   :  { %v192_v22 = vadd.f32 %v351_v20, %v191_v21  ;;  %v415_v23 = vpop.f32.mrb[1].mxu0 }
 0x152   :  { %v194_v24 = vpop.f32.mrb[2].mxu0 }
 0x153   :  { %v195_v25 = vadd.f32 %v351_v20, %v194_v24  ;;  %v416_v26 = vpop.f32.mrb[3].mxu0  ;;  %476 = vtanh.f32 %v192_v22 }
 0x155   :  { %478 = vtanh.f32 %v195_v25 }
 0x15d   :  { %v477_v27 = vpop.eup %476 }
 0x15f   :  { %v479_v28 = vpop.eup %478 }
 0x160   :  { %v200_v29 = vpack.c.bf16 %v479_v28, %v477_v27 }
 0x162   :  { %434 = vmatmul.mubr.bf16.vlgmr.msra.gmra.mrb[0].mxu1 %v200_v29 }
 0x235   :  { %v306_v31 = vpop.f32.mrb[0].mxu1 }
 0x236   :  { %v307_v32 = vadd.f32 %v360_v30, %v306_v31  ;;  %v435_v33 = vpop.f32.mrb[1].mxu1 }
 0x237   :  { %v309_v34 = vpop.f32.mrb[2].mxu1 }
 0x238   :  { %v310_v35 = vadd.f32 %v360_v30, %v309_v34  ;;  %v436_v36 = vpop.f32.mrb[3].mxu1  ;;  %480 = vtanh.f32 %v307_v32 }
 0x23a   :  { %482 = vtanh.f32 %v310_v35 }
 0x242   :  { %v481_v37 = vpop.eup %480 }
 0x244   :  { %v483_v38 = vpop.eup %482 }
 0x245   :  { %v377_v39 = vpack.c.bf16 %v483_v38, %v481_v37 }
 0x247   :  { %378 = vst [vmem:[%s699_s6] sm:$0xff] %v377_v39  }
 0x248   :  { %329 = vsyncpa [#allocation7], 1 }
 0x249   :  { %330 = vsyncpa [#allocation9], 1 }
 0x24a   :  { %331 = vsyncmov [#allocation3] }
 0x24d   :  { %s332_s28 = vpop.sfrf %331 }
 0x24e   :  { %p371_p5 = scmp.ne.s32.totalorder %s332_s28, 0 }
 0x250   :  { %336 = shalt.err (%p371_p5)  }

// kernel: _generator_impl.1
= control target key start
LH: loop header
LB: loop body
LE: loop exit
PB: predicated region body
PF: predicated region fallthrough
CT: control target
= control target key end

     0   :  { %s693_s0 = inlined_call_operand.hbm [shape: s32[16], index: 0, kind: input, shape index: {}]   ;;  %s694_s1 = inlined_call_operand.hbm [shape: f32[64,128], index: 1, kind: input, shape index: {}]   ;;  %s695_s2 = inlined_call_operand.hbm [shape: bf16[128,128], index: 2, kind: input, shape index: {}]   ;;  %s696_s3 = inlined_call_operand.vmem [shape: f32[1,128], index: 3, kind: input, shape index: {}]   ;;  %s697_s4 = inlined_call_operand.hbm [shape: bf16[128,128], index: 4, kind: input, shape index: {}]   ;;  %s698_s5 = inlined_call_operand.vmem [shape: f32[1,128], index: 5, kind: input, shape index: {}]   ;;  %s699_s6 = inlined_call_operand.vmem [shape: bf16[16,128], index: 6, kind: output, shape index: {}]  }
   0x1   :  { %s484_s23 = scalar_lea.hbm %s693_s0, 16 }
   0x2   :  { %p485_p0 = scmp.ne.s32.totalorder %s693_s0, %s484_s23  ;;  %p488_p1 = scmp.lt.u32.totalorder %s484_s23, %s693_s0 }
   0x4   :  { %p490_p2 = pnand %p488_p1, %p485_p0 }
   0x6   :  { %493 = shalt.err (!%p490_p2)  }
   0x7   :  { %s586_s28 = smov [#allocation5]  }
   0x8   :  { %12 = dma.hbm_to_smem %s693_s0, 16, %s586_s28, [#allocation4] }
   0x9   :  { %570 = dma.done.wait [#allocation4], 16 }
   0xa   :  { %571 = vsyncadd [#allocation4], 4294967280 }
   0xb   :  { %14 = sfence }
   0xc   :  { %15 = vsyncpa [#allocation7], 0 }
   0xd   :  { %16 = vsyncpa [#allocation9], 0  ;;  %s587_s7 = smov [#allocation6]   ;;  %s494_s11 = scalar_lea.hbm %s695_s2, 1024 }
   0xe   :  { %s22_s8 = sshll.u32 %s587_s7, 4  ;;  %p495_p3 = scmp.ne.s32.totalorder %s695_s2, %s494_s11  ;;  %s23_s8 = int_to_ptr.vmem [resolvable:$true] %s22_s8 }
   0xf   :  { %p498_p4 = scmp.lt.u32.totalorder %s494_s11, %s695_s2 }
  0x11   :  { %p500_p5 = pnand %p498_p4, %p495_p3 }
  0x13   :  { %503 = shalt.err (!%p500_p5)
}
  0x14   :  { %s504_s0 = scalar_lea.vmem %s23_s8, 1024  ;;  %p509_p7 = scmp.lt.s32.totalorder %s23_s8, %s23_s8 }
  0x15   :  { %p505_p6 = scmp.ne.s32.totalorder %s23_s8, %s504_s0  ;;  %p510_p8 = scmp.lt.s32.totalorder %s504_s0, %s504_s0 }
  0x17   :  { %p511_p9 = por %p510_p8, %p509_p7 }
  0x19   :  { %p512_p10 = pnand %p511_p9, %p505_p6 }
  0x1b   :  { %515 = shalt.err (!%p512_p10)
}
  0x1c   :  { %s588_s16 = smov 64   ;;  %s589_s17 = smov 4  }
  0x1d   :  { %28 = dma.hbm_to_vmem [thread:$0]  %s695_s2, 1024, %s23_s8, [#allocation7], %s588_s16, %s588_s16, %s589_s17  }
  0x1e   :  { %s590_s20 = smov [#allocation8]   ;;  %s516_s24 = scalar_lea.hbm %s697_s4, 1024 }
  0x1f   :  { %s36_s21 = sshll.u32 %s590_s20, 4  ;;  %p517_p11 = scmp.ne.s32.totalorder %s697_s4, %s516_s24  ;;  %s37_s21 = int_to_ptr.vmem [resolvable:$true] %s36_s21 }
  0x20   :  { %p520_p12 = scmp.lt.u32.totalorder %s516_s24, %s697_s4 }
  0x22   :  { %p522_p13 = pnand %p520_p12, %p517_p11 }
  0x24   :  { %525 = shalt.err (!%p522_p13)
}
  0x25   :  { %s526_s29 = scalar_lea.vmem %s37_s21, 1024  ;;  %p531_p1 = scmp.lt.s32.totalorder %s37_s21, %s37_s21 }
  0x26   :  { %p527_p0 = scmp.ne.s32.totalorder %s37_s21, %s526_s29  ;;  %p532_p2 = scmp.lt.s32.totalorder %s526_s29, %s526_s29 }
  0x28   :  { %p533_p3 = por %p532_p2, %p531_p1 }
  0x2a   :  { %p534_p4 = pnand %p533_p3, %p527_p0 }
  0x2c   :  { %537 = shalt.err (!%p534_p4)
}
  0x2d   :  { %42 = dma.hbm_to_vmem [thread:$0]  %s697_s4, 1024, %s37_s21, [#allocation9], %s588_s16, %s588_s16, %s589_s17  }
  0x2e   :  { %572 = dma.done.wait [#allocation7], 1024  }
  0x2f   :  { %573 = vsyncadd [#allocation7], 4294966272 }
  0x30   :  { %574 = dma.done.wait [#allocation9], 1024  }
  0x31   :  { %575 = vsyncadd [#allocation9], 4294966272  ;;  %s665_s7 = smov 0  }
  0x32 LB: > { %s60_s8 = sld [smem:[#allocation5 + %s580_s7]]  ;;  %s63_s9 = scalar_lea.vmem [#allocation2], %s580_s7  ;;  %s580_s7 = sphi %s665_s7, %s58_s7  }
  0x33   : > { %s71_s10 = sshll.u32 %s63_s9, 4  ;;  %s540_s16 = scalar_lea.hbm %s694_s1, 1024  ;;  %s72_s10 = int_to_ptr.vmem [resolvable:$true] %s71_s10 }
  0x38   : > { %s350_s11 = sshll.u32 %s60_s8, 4 }
  0x39   : > { %s62_s13 = scalar_lea.hbm %s694_s1, %s350_s11 }
  0x3a   : > { %s538_s14 = scalar_lea.hbm %s62_s13, 16  ;;  %p541_p6 = scmp.lt.u32.totalorder %s62_s13, %s694_s1 }
  0x3b   : > { %p539_p5 = scmp.ne.s32.totalorder %s62_s13, %s538_s14  ;;  %p542_p7 = scmp.lt.u32.totalorder %s540_s16, %s538_s14 }
  0x3c   : > { %p544_p9 = scmp.lt.u32.totalorder %s538_s14, %s62_s13 }
  0x3d   : > { %p543_p8 = por %p542_p7, %p541_p6 }
  0x3f   : > { %p545_p10 = por %p544_p9, %p543_p8 }
  0x41   : > { %p546_p11 = pnand %p545_p10, %p539_p5 }
  0x43   : > { %549 = shalt.err (!%p546_p11)  }
  0x44   : > { %s550_s19 = scalar_lea.vmem %s72_s10, 16  ;;  %s591_s20 = smov [#allocation2]  }
  0x45   : > { %p551_p12 = scmp.ne.s32.totalorder %s72_s10, %s550_s19  ;;  %s552_s21 = sshll.u32 %s591_s20, 4  ;;  %s553_s21 = int_to_ptr.vmem [resolvable:$false] %s552_s21 }
  0x46   : > { %s554_s22 = scalar_lea.vmem %s553_s21, 256  ;;  %p555_p13 = scmp.lt.s32.totalorder %s72_s10, %s553_s21 }
  0x47   : > { %p556_p0 = scmp.lt.s32.totalorder %s554_s22, %s550_s19 }
  0x49   : > { %p557_p1 = por %p556_p0, %p555_p13 }
  0x4b   : > { %p558_p2 = pnand %p557_p1, %p551_p12 }
  0x4d   : > { %561 = shalt.err (!%p558_p2)  }
  0x4e   : > { %74 = dma.hbm_to_vmem [thread:$0]  %s62_s13, 16, %s72_s10, [#allocation3] }
  0x4f   : > { %s58_s7 = sadd.s32 1, %s580_s7  }
  0x50   : > { %p55_p3 = scmp.ge.s32.totalorder %s58_s7, 16  }
  0x51   :  { %s582_s23 = smov (%p55_p3), 0  }
  0x52   :  { %57 = sbr.rel (!%p55_p3) target bundleno = 50 (0x32), region = 64 }
  0x59 LB: > { %576 = dma.done.wait [#allocation3], 16  ;;  %s584_s23 = sphi %s582_s23, %s80_s23  }
  0x5a   : > { %577 = vsyncadd [#allocation3], 4294967280  ;;  %s80_s23 = sadd.s32 1, %s584_s23  }
  0x5b   : > { %p77_p4 = scmp.ge.s32.totalorder %s80_s23, 16  }
  0x5c   :  { %v460_v0 = vld [vmem:[#allocation6] sm:$0xff] (%p77_p4)   ;;  %v592_v1 = vmov (%p77_p4), 0.0   ;;  %v461_v2 = vld [vmem:[#allocation6 + $0x8] sm:$0xff] (%p77_p4)   ;;  %vm593_vm0 = vmmov (%p77_p4), 0   ;;  %v462_v3 = vld [vmem:[#allocation6 + $0x10] sm:$0xff] (%p77_p4)  }
  0x5d   :  { %79 = sbr.rel (!%p77_p4) target bundleno = 89 (0x59), region = 75  ;;  %397 = vmatprep.subr.bf16.mxu0 (%p77_p4), %v592_v1  ;;  %417 = vmatprep.subr.bf16.mxu1 (%p77_p4), %v592_v1  ;;  %v468_v4 = vld [vmem:[#allocation8] sm:$0xff] (%p77_p4)   ;;  %v463_v5 = vld [vmem:[#allocation6 + $0x18] sm:$0xff] (%p77_p4)   ;;  %v469_v6 = vld [vmem:[#allocation8 + $0x8] sm:$0xff] (%p77_p4)  }
  0x5e   :  { %398 = vmatpush3.bf16.msra.mxu0 (%p77_p4), %v460_v0  ;;  %413 = vmatprep.mubr.msk.bf16.mxu0 (%p77_p4), %vm593_vm0, %v592_v1  ;;  %v464_v7 = vld [vmem:[#allocation6 + $0x20] sm:$0xff] (%p77_p4)   ;;  %v470_v8 = vld [vmem:[#allocation8 + $0x10] sm:$0xff] (%p77_p4)   ;;  %v465_v9 = vld [vmem:[#allocation6 + $0x28] sm:$0xff] (%p77_p4)  }
  0x5f   :  { %399 = vmatprep.subr.bf16.mxu0 (%p77_p4), %v592_v1  ;;  %433 = vmatprep.mubr.msk.bf16.mxu1 (%p77_p4), %vm593_vm0, %v592_v1  ;;  %v471_v10 = vld [vmem:[#allocation8 + $0x18] sm:$0xff] (%p77_p4)   ;;  %v466_v11 = vld [vmem:[#allocation6 + $0x30] sm:$0xff] (%p77_p4)   ;;  %v472_v16 = vld [vmem:[#allocation8 + $0x20] sm:$0xff] (%p77_p4)  }
  0x60   :  { %418 = vmatpush3.bf16.msra.mxu1 (%p77_p4), %v468_v4  ;;  %v467_v12 = vld [vmem:[#allocation6 + $0x38] sm:$0xff] (%p77_p4)   ;;  %v83_v13 = vld [vmem:[#allocation2] sm:$0xff] (%p77_p4)  ;;  %v473_v17 = vld [vmem:[#allocation8 + $0x28] sm:$0xff] (%p77_p4)  }
  0x61   :  { %419 = vmatprep.subr.bf16.mxu1 (%p77_p4), %v592_v1  ;;  %v84_v14 = vld [vmem:[#allocation2 + $0x8] sm:$0xff] (%p77_p4)  ;;  %v474_v18 = vld [vmem:[#allocation8 + $0x30] sm:$0xff] (%p77_p4)  }
  0x62   :  { %400 = vmatpush3.bf16.msra.mxu0 (%p77_p4), %v461_v2  ;;  %v85_v15 = vpack.c.bf16 (%p77_p4), %v84_v14, %v83_v13  ;;  %v475_v19 = vld [vmem:[#allocation8 + $0x38] sm:$0xff] (%p77_p4)   ;;  %v351_v20 = vld [vmem:[%s696_s3] ss:$0 sm:$0xff] (%p77_p4) }
  0x63   :  { %401 = vmatprep.subr.bf16.mxu0 (%p77_p4), %v592_v1  ;;  %v360_v30 = vld [vmem:[%s698_s5] ss:$0 sm:$0xff] (%p77_p4) }
  0x64   :  { %420 = vmatpush3.bf16.msra.mxu1 %v469_v6 }
  0x65   :  { %421 = vmatprep.subr.bf16.mxu1 %v592_v1 }
  0x66   :  { %402 = vmatpush3.bf16.msra.mxu0 %v462_v3 }
  0x67   :  { %403 = vmatprep.subr.bf16.mxu0 %v592_v1 }
  0x68   :  { %422 = vmatpush3.bf16.msra.mxu1 %v470_v8 }
  0x69   :  { %423 = vmatprep.subr.bf16.mxu1 %v592_v1 }
  0x6a   :  { %404 = vmatpush3.bf16.msra.mxu0 %v463_v5 }
  0x6b   :  { %405 = vmatprep.subr.bf16.mxu0 %v592_v1 }
  0x6c   :  { %424 = vmatpush3.bf16.msra.mxu1 %v471_v10 }
  0x6d   :  { %425 = vmatprep.subr.bf16.mxu1 %v592_v1 }
  0x6e   :  { %406 = vmatpush3.bf16.msra.mxu0 %v464_v7 }
  0x6f   :  { %407 = vmatprep.subr.bf16.mxu0 %v592_v1 }
  0x70   :  { %426 = vmatpush3.bf16.msra.mxu1 %v472_v16 }
  0x71   :  { %427 = vmatprep.subr.bf16.mxu1 %v592_v1 }
  0x72   :  { %408 = vmatpush3.bf16.msra.mxu0 %v465_v9 }
  0x73   :  { %409 = vmatprep.subr.bf16.mxu0 %v592_v1 }
  0x74   :  { %428 = vmatpush3.bf16.msra.mxu1 %v473_v17 }
  0x75   :  { %429 = vmatprep.subr.bf16.mxu1 %v592_v1 }
  0x76   :  { %410 = vmatpush3.bf16.msra.mxu0 %v466_v11 }
  0x77   :  { %411 = vmatprep.subr.bf16.mxu0 %v592_v1 }
  0x78   :  { %430 = vmatpush3.bf16.msra.mxu1 %v474_v18 }
  0x79   :  { %431 = vmatprep.subr.bf16.mxu1 %v592_v1 }
  0x7a   :  { %412 = vmatpush3.bf16.msra.mxu0 %v467_v12 }
  0x7c   :  { %432 = vmatpush3.bf16.msra.mxu1 %v475_v19 }
  0x7d   :  { %414 = vmatmul.mubr.bf16.vlgmr.msra.gmra.mrb[0].mxu0 %v85_v15 }
 0x150   :  { %v191_v21 = vpop.f32.mrb[0].mxu0 }
 0x151   :  { %v192_v22 = vadd.f32 %v351_v20, %v191_v21  ;;  %v415_v23 = vpop.f32.mrb[1].mxu0 }
 0x152   :  { %v194_v24 = vpop.f32.mrb[2].mxu0 }
 0x153   :  { %v195_v25 = vadd.f32 %v351_v20, %v194_v24  ;;  %v416_v26 = vpop.f32.mrb[3].mxu0  ;;  %476 = vtanh.f32 %v192_v22 }
 0x155   :  { %478 = vtanh.f32 %v195_v25 }
 0x15d   :  { %v477_v27 = vpop.eup %476 }
 0x15f   :  { %v479_v28 = vpop.eup %478 }
 0x160   :  { %v200_v29 = vpack.c.bf16 %v479_v28, %v477_v27 }
 0x162   :  { %434 = vmatmul.mubr.bf16.vlgmr.msra.gmra.mrb[0].mxu1 %v200_v29 }
 0x235   :  { %v306_v31 = vpop.f32.mrb[0].mxu1 }
 0x236   :  { %v307_v32 = vadd.f32 %v360_v30, %v306_v31  ;;  %v435_v33 = vpop.f32.mrb[1].mxu1 }
 0x237   :  { %v309_v34 = vpop.f32.mrb[2].mxu1 }
 0x238   :  { %v310_v35 = vadd.f32 %v360_v30, %v309_v34  ;;  %v436_v36 = vpop.f32.mrb[3].mxu1  ;;  %480 = vtanh.f32 %v307_v32 }
 0x23a   :  { %482 = vtanh.f32 %v310_v35 }
 0x242   :  { %v481_v37 = vpop.eup %480 }
 0x244   :  { %v483_v38 = vpop.eup %482 }
 0x245   :  { %v377_v39 = vpack.c.bf16 %v483_v38, %v481_v37 }
 0x247   :  { %378 = vst [vmem:[%s699_s6] sm:$0xff] %v377_v39  }
 0x248   :  { %329 = vsyncpa [#allocation7], 1 }
 0x249   :  { %330 = vsyncpa [#allocation9], 1 }
 0x24a   :  { %331 = vsyncmov [#allocation3] }
 0x24d   :  { %s332_s28 = vpop.sfrf %331 }
 0x24e   :  { %p371_p5 = scmp.ne.s32.totalorder %s332_s28, 0 }
 0x250   :  { %336 = shalt.err (%p371_p5)  }

</bundles_post_ra>
